<compile_context>
chip_gen: v7x
topology: tpu7x:2x2x1
jax: 0.10.0
libtpu: 0.0.40
codegen_flags: <defaults>
</compile_context>

<pallas_src>
import jax
import jax.numpy as jnp
from jax.experimental import pallas as pl
from jax.experimental.pallas import tpu as pltpu

EPS = 1e-5  # torch.nn.InstanceNorm2d default eps


def _shift_flat(t, off):
    """Cyclic shift along the flat lane axis: result[:, i] = t[:, i + off].

    Lane-contiguous slice+concat (guaranteed semantics); the wrapped lanes are
    overwritten by the reflection boundary fixup in the caller.
    (pltpu.roll is the pure-XLU alternative for very large H*W.)
    """
    n = t.shape[1]
    o = off % n
    if o == 0:
        return t
    return jnp.concatenate([t[:, o:], t[:, :o]], axis=1)


def _make_kernel(C, H, W):
    HW = H * W
    inv_n = 1.0 / float(HW)

    def kernel(x_ref, w1_ref, b1_ref, w2_ref, b2_ref, o_ref, im_ref):
        x = x_ref[0].astype(jnp.float32)                       # (C, HW)

        # Reflection-boundary masks, computed once per grid step.
        idx = jax.lax.broadcasted_iota(jnp.int32, (C, HW), 1)
        col = idx % W
        is_c0 = col == 0
        is_cW = col == W - 1
        is_r0 = idx < W
        is_rH = idx >= (H - 1) * W

        def conv3x3(t, w_ref, b_ref):
            # dx shifts (reflection at the W boundaries), lane-dense.
            t_p1 = _shift_flat(t, 1)       # t[:, i+1]
            t_m1 = _shift_flat(t, -1)      # t[:, i-1]
            x_variants = (
                jnp.where(is_c0, t_p1, t_m1),   # dx = -1
                t,                               # dx =  0
                jnp.where(is_cW, t_m1, t_p1),   # dx = +1
            )
            # dy shifts on each dx variant, packed into the im2col scratch in
            # tap order k = (dy+1)*3 + (dx+1), each tap occupying C rows.
            for dxi, tx in enumerate(x_variants):
                tx_pW = _shift_flat(tx, W)      # next row
                tx_mW = _shift_flat(tx, -W)     # previous row
                im_ref[pl.ds((0 * 3 + dxi) * C, C), :] = jnp.where(is_r0, tx_pW, tx_mW)  # dy=-1
                im_ref[pl.ds((1 * 3 + dxi) * C, C), :] = tx                              # dy= 0
                im_ref[pl.ds((2 * 3 + dxi) * C, C), :] = jnp.where(is_rH, tx_mW, tx_pW)  # dy=+1
            # Single fused contraction over (tap, c_in): (C, 9C) @ (9C, HW).
            y = jnp.dot(
                w_ref[...], im_ref[...],
                preferred_element_type=jnp.float32,
                precision=jax.lax.Precision.HIGHEST,
            )
            return y + b_ref[...]                               # bias (C,1) bcast

        def instance_norm(y):
            # One-pass fused stats: per-channel sum and sum of squares (f32).
            s = jnp.sum(y, axis=1, keepdims=True)
            ss = jnp.sum(y * y, axis=1, keepdims=True)
            mean = s * inv_n
            var = jnp.maximum(ss * inv_n - mean * mean, 0.0)
            return (y - mean) * jax.lax.rsqrt(var + EPS)

        h = jnp.maximum(instance_norm(conv3x3(x, w1_ref, b1_ref)), 0.0)  # ReLU
        h = instance_norm(conv3x3(h, w2_ref, b2_ref))
        o_ref[0] = (x + h).astype(o_ref.dtype)                  # skip connection

    return kernel


def residual_block(x, w1, b1, w2, b2):
    """x: (B, C, H, W) f32; w*: (C, C, 3, 3); b*: (C,). Returns (B, C, H, W)."""
    B, C, H, W = x.shape
    HW = H * W

    # Lane-dense layout: last dim is H*W (multiple of 128 for typical sizes).
    x_flat = x.reshape(B, C, HW)
    # im2col weight layout: W_mat[c_out, ((dy+1)*3 + (dx+1))*C + c_in]
    #                        = w[c_out, c_in, dy+1, dx+1]
    w1_m = jnp.transpose(w1, (0, 2, 3, 1)).reshape(C, 9 * C)
    w2_m = jnp.transpose(w2, (0, 2, 3, 1)).reshape(C, 9 * C)
    b1_c = b1.reshape(C, 1)
    b2_c = b2.reshape(C, 1)

    out_flat = pl.pallas_call(
        _make_kernel(C, H, W),
        out_shape=jax.ShapeDtypeStruct((B, C, HW), x.dtype),
        grid_spec=pltpu.PrefetchScalarGridSpec(
            num_scalar_prefetch=0,
            grid=(B,),
            in_specs=[
                pl.BlockSpec((1, C, HW), lambda b: (b, 0, 0)),
                pl.BlockSpec((C, 9 * C), lambda b: (0, 0)),
                pl.BlockSpec((C, 1), lambda b: (0, 0)),
                pl.BlockSpec((C, 9 * C), lambda b: (0, 0)),
                pl.BlockSpec((C, 1), lambda b: (0, 0)),
            ],
            out_specs=pl.BlockSpec((1, C, HW), lambda b: (b, 0, 0)),
            scratch_shapes=[pltpu.VMEM((9 * C, HW), jnp.float32)],  # im2col buffer
        ),
        compiler_params=pltpu.CompilerParams(
            dimension_semantics=("parallel",),
            vmem_limit_bytes=32 * 1024 * 1024,
        ),
    )(x_flat, w1_m, b1_c, w2_m, b2_c)

    return out_flat.reshape(B, C, H, W)


def _reference(x, w1, b1, w2, b2):
    # Pure-JAX reference mirroring the PyTorch module.
    def refpad(t):
        return jnp.pad(t, ((0, 0), (0, 0), (1, 1), (1, 1)), mode="reflect")

    def conv(t, w, b):
        y = jax.lax.conv_general_dilated(
            refpad(t), w, (1, 1), "VALID",
            dimension_numbers=("NCHW", "OIHW", "NCHW"),
            precision=jax.lax.Precision.HIGHEST,
        )
        return y + b[None, :, None, None]

    def inorm(t):
        m = t.mean(axis=(2, 3), keepdims=True)
        v = ((t - m) ** 2).mean(axis=(2, 3), keepdims=True)
        return (t - m) * jax.lax.rsqrt(v + EPS)

    h = jax.nn.relu(inorm(conv(x, w1, b1)))
    h = inorm(conv(h, w2, b2))
    return x + h


if __name__ == "__main__":
    B, C, H, W = 2, 4, 16, 16
    key = jax.random.PRNGKey(0)
    kx, kw1, kb1, kw2, kb2 = jax.random.split(key, 5)

    x = jax.random.normal(kx, (B, C, H, W), dtype=jnp.float32)
    # Deterministic synthetic parameters (shapes from nn.Conv2d(C, C, 3)).
    w1 = jax.random.normal(kw1, (C, C, 3, 3), dtype=jnp.float32) * 0.1
    b1 = jax.random.normal(kb1, (C,), dtype=jnp.float32) * 0.1
    w2 = jax.random.normal(kw2, (C, C, 3, 3), dtype=jnp.float32) * 0.1
    b2 = jax.random.normal(kb2, (C,), dtype=jnp.float32) * 0.1

    out = jax.block_until_ready(residual_block(x, w1, b1, w2, b2))
    ref = jax.block_until_ready(_reference(x, w1, b1, w2, b2))

    assert out.shape == (B, C, H, W)
    assert jnp.allclose(out, ref, atol=1e-4, rtol=1e-4), "mismatch vs reference"

    print("KERNEL_OK")
</pallas_src>

<mosaic_0001>
module attributes {stable_mosaic.version = 11 : i64} {
  func.func @kernel(%arg0: i32, %arg1: memref<1x4x256xf32, #tpu.memory_space<vmem>>, %arg2: memref<4x36xf32, #tpu.memory_space<vmem>>, %arg3: memref<4x1xf32, #tpu.memory_space<vmem>>, %arg4: memref<4x36xf32, #tpu.memory_space<vmem>>, %arg5: memref<4x1xf32, #tpu.memory_space<vmem>>, %arg6: memref<1x4x256xf32, #tpu.memory_space<vmem>>, %arg7: memref<36x256xf32, #tpu.memory_space<vmem>>) attributes {dimension_semantics = [#tpu.dimension_semantics<parallel>], iteration_bounds = array<i64: 2>, scalar_prefetch = 0 : i64, scratch_operands = 1 : i64, tpu.core_type = #tpu.core_type<tc>, window_params = [{transform_indices = @transform_0, window_bounds = array<i64: 1, 4, 256>}, {pipeline_mode = #tpu.pipeline_mode<synchronous>, transform_indices = @transform_1, window_bounds = array<i64: 4, 36>}, {pipeline_mode = #tpu.pipeline_mode<synchronous>, transform_indices = @transform_2, window_bounds = array<i64: 4, 1>}, {pipeline_mode = #tpu.pipeline_mode<synchronous>, transform_indices = @transform_3, window_bounds = array<i64: 4, 36>}, {pipeline_mode = #tpu.pipeline_mode<synchronous>, transform_indices = @transform_4, window_bounds = array<i64: 4, 1>}, {transform_indices = @transform_5, window_bounds = array<i64: 1, 4, 256>}]} {
    %c0 = arith.constant 0 : index
    %c0_0 = arith.constant 0 : index
    %c0_1 = arith.constant 0 : index
    %0 = vector.load %arg1[%c0, %c0_0, %c0_1] : memref<1x4x256xf32, #tpu.memory_space<vmem>>, vector<1x4x256xf32>
    %1 = vector.shape_cast %0 : vector<1x4x256xf32> to vector<4x256xf32>
    %2 = tpu.iota {dimensions = array<i32: 1>} : vector<4x256xi32>
    %c16_i32 = arith.constant 16 : i32
    %c0_i32 = arith.constant 0 : i32
    %3 = arith.cmpi eq, %c16_i32, %c0_i32 : i32
    %c1_i32 = arith.constant 1 : i32
    %4 = arith.select %3, %c1_i32, %c16_i32 : i32
    %5 = vector.broadcast %4 : i32 to vector<4x256xi32>
    %6 = arith.remsi %2, %5 : vector<4x256xi32>
    %c0_i32_2 = arith.constant 0 : i32
    %7 = vector.broadcast %c0_i32_2 : i32 to vector<4x256xi32>
    %8 = arith.cmpi ne, %6, %7 : vector<4x256xi32>
    %c0_i32_3 = arith.constant 0 : i32
    %9 = vector.broadcast %c0_i32_3 : i32 to vector<4x256xi32>
    %10 = arith.cmpi slt, %6, %9 : vector<4x256xi32>
    %c0_i32_4 = arith.constant 0 : i32
    %11 = arith.cmpi slt, %4, %c0_i32_4 : i32
    %12 = vector.broadcast %11 : i1 to vector<4x256xi1>
    %13 = vector.broadcast %12 : vector<4x256xi1> to vector<4x256xi1>
    %14 = arith.xori %10, %13 : vector<4x256xi1>
    %15 = arith.andi %14, %8 : vector<4x256xi1>
    %16 = vector.broadcast %4 : i32 to vector<4x256xi32>
    %17 = arith.addi %6, %16 : vector<4x256xi32>
    %18 = arith.select %15, %17, %6 : vector<4x256xi1>, vector<4x256xi32>
    %c0_i32_5 = arith.constant 0 : i32
    %19 = vector.broadcast %c0_i32_5 : i32 to vector<4x256xi32>
    %20 = arith.cmpi eq, %18, %19 : vector<4x256xi32>
    %c15_i32 = arith.constant 15 : i32
    %21 = vector.broadcast %c15_i32 : i32 to vector<4x256xi32>
    %22 = arith.cmpi eq, %18, %21 : vector<4x256xi32>
    %c16_i32_6 = arith.constant 16 : i32
    %23 = vector.broadcast %c16_i32_6 : i32 to vector<4x256xi32>
    %24 = arith.cmpi slt, %2, %23 : vector<4x256xi32>
    %c240_i32 = arith.constant 240 : i32
    %25 = vector.broadcast %c240_i32 : i32 to vector<4x256xi32>
    %26 = arith.cmpi sge, %2, %25 : vector<4x256xi32>
    %27 = vector.extract_strided_slice %1 {offsets = [0, 1], sizes = [4, 255], strides = [1, 1]} : vector<4x256xf32> to vector<4x255xf32>
    %28 = vector.extract_strided_slice %1 {offsets = [0, 0], sizes = [4, 1], strides = [1, 1]} : vector<4x256xf32> to vector<4x1xf32>
    %29 = tpu.concatenate %27, %28 in 1 : vector<4x255xf32>, vector<4x1xf32> -> vector<4x256xf32>
    %30 = vector.extract_strided_slice %1 {offsets = [0, 255], sizes = [4, 1], strides = [1, 1]} : vector<4x256xf32> to vector<4x1xf32>
    %31 = vector.extract_strided_slice %1 {offsets = [0, 0], sizes = [4, 255], strides = [1, 1]} : vector<4x256xf32> to vector<4x255xf32>
    %32 = tpu.concatenate %30, %31 in 1 : vector<4x1xf32>, vector<4x255xf32> -> vector<4x256xf32>
    %33 = arith.select %20, %29, %32 : vector<4x256xi1>, vector<4x256xf32>
    %34 = arith.select %22, %32, %29 : vector<4x256xi1>, vector<4x256xf32>
    %35 = vector.extract_strided_slice %33 {offsets = [0, 16], sizes = [4, 240], strides = [1, 1]} : vector<4x256xf32> to vector<4x240xf32>
    %36 = vector.extract_strided_slice %33 {offsets = [0, 0], sizes = [4, 16], strides = [1, 1]} : vector<4x256xf32> to vector<4x16xf32>
    %37 = tpu.concatenate %35, %36 in 1 : vector<4x240xf32>, vector<4x16xf32> -> vector<4x256xf32>
    %38 = vector.extract_strided_slice %33 {offsets = [0, 240], sizes = [4, 16], strides = [1, 1]} : vector<4x256xf32> to vector<4x16xf32>
    %39 = vector.extract_strided_slice %33 {offsets = [0, 0], sizes = [4, 240], strides = [1, 1]} : vector<4x256xf32> to vector<4x240xf32>
    %40 = tpu.concatenate %38, %39 in 1 : vector<4x16xf32>, vector<4x240xf32> -> vector<4x256xf32>
    %41 = arith.select %24, %37, %40 : vector<4x256xi1>, vector<4x256xf32>
    %c0_7 = arith.constant 0 : index
    %c0_8 = arith.constant 0 : index
    %42 = vector.load %arg7[%c0_7, %c0_8] : memref<36x256xf32, #tpu.memory_space<vmem>>, vector<4x256xf32>
    tpu.vector_store %arg7[%c0_7, %c0_8], %41 {strides = array<i32>} : memref<36x256xf32, #tpu.memory_space<vmem>>, vector<4x256xf32>,
    %c12 = arith.constant 12 : index
    %c0_9 = arith.constant 0 : index
    %43 = vector.load %arg7[%c12, %c0_9] : memref<36x256xf32, #tpu.memory_space<vmem>>, vector<4x256xf32>
    tpu.vector_store %arg7[%c12, %c0_9], %33 {strides = array<i32>} : memref<36x256xf32, #tpu.memory_space<vmem>>, vector<4x256xf32>,
    %44 = arith.select %26, %40, %37 : vector<4x256xi1>, vector<4x256xf32>
    %c24 = arith.constant 24 : index
    %c0_10 = arith.constant 0 : index
    %45 = vector.load %arg7[%c24, %c0_10] : memref<36x256xf32, #tpu.memory_space<vmem>>, vector<4x256xf32>
    tpu.vector_store %arg7[%c24, %c0_10], %44 {strides = array<i32>} : memref<36x256xf32, #tpu.memory_space<vmem>>, vector<4x256xf32>,
    %46 = vector.extract_strided_slice %1 {offsets = [0, 16], sizes = [4, 240], strides = [1, 1]} : vector<4x256xf32> to vector<4x240xf32>
    %47 = vector.extract_strided_slice %1 {offsets = [0, 0], sizes = [4, 16], strides = [1, 1]} : vector<4x256xf32> to vector<4x16xf32>
    %48 = tpu.concatenate %46, %47 in 1 : vector<4x240xf32>, vector<4x16xf32> -> vector<4x256xf32>
    %49 = vector.extract_strided_slice %1 {offsets = [0, 240], sizes = [4, 16], strides = [1, 1]} : vector<4x256xf32> to vector<4x16xf32>
    %50 = vector.extract_strided_slice %1 {offsets = [0, 0], sizes = [4, 240], strides = [1, 1]} : vector<4x256xf32> to vector<4x240xf32>
    %51 = tpu.concatenate %49, %50 in 1 : vector<4x16xf32>, vector<4x240xf32> -> vector<4x256xf32>
    %52 = arith.select %24, %48, %51 : vector<4x256xi1>, vector<4x256xf32>
    %c4 = arith.constant 4 : index
    %c0_11 = arith.constant 0 : index
    %53 = vector.load %arg7[%c4, %c0_11] : memref<36x256xf32, #tpu.memory_space<vmem>>, vector<4x256xf32>
    tpu.vector_store %arg7[%c4, %c0_11], %52 {strides = array<i32>} : memref<36x256xf32, #tpu.memory_space<vmem>>, vector<4x256xf32>,
    %c16 = arith.constant 16 : index
    %c0_12 = arith.constant 0 : index
    %54 = vector.load %arg7[%c16, %c0_12] : memref<36x256xf32, #tpu.memory_space<vmem>>, vector<4x256xf32>
    tpu.vector_store %arg7[%c16, %c0_12], %1 {strides = array<i32>} : memref<36x256xf32, #tpu.memory_space<vmem>>, vector<4x256xf32>,
    %55 = arith.select %26, %51, %48 : vector<4x256xi1>, vector<4x256xf32>
    %c28 = arith.constant 28 : index
    %c0_13 = arith.constant 0 : index
    %56 = vector.load %arg7[%c28, %c0_13] : memref<36x256xf32, #tpu.memory_space<vmem>>, vector<4x256xf32>
    tpu.vector_store %arg7[%c28, %c0_13], %55 {strides = array<i32>} : memref<36x256xf32, #tpu.memory_space<vmem>>, vector<4x256xf32>,
    %57 = vector.extract_strided_slice %34 {offsets = [0, 16], sizes = [4, 240], strides = [1, 1]} : vector<4x256xf32> to vector<4x240xf32>
    %58 = vector.extract_strided_slice %34 {offsets = [0, 0], sizes = [4, 16], strides = [1, 1]} : vector<4x256xf32> to vector<4x16xf32>
    %59 = tpu.concatenate %57, %58 in 1 : vector<4x240xf32>, vector<4x16xf32> -> vector<4x256xf32>
    %60 = vector.extract_strided_slice %34 {offsets = [0, 240], sizes = [4, 16], strides = [1, 1]} : vector<4x256xf32> to vector<4x16xf32>
    %61 = vector.extract_strided_slice %34 {offsets = [0, 0], sizes = [4, 240], strides = [1, 1]} : vector<4x256xf32> to vector<4x240xf32>
    %62 = tpu.concatenate %60, %61 in 1 : vector<4x16xf32>, vector<4x240xf32> -> vector<4x256xf32>
    %63 = arith.select %24, %59, %62 : vector<4x256xi1>, vector<4x256xf32>
    %c8 = arith.constant 8 : index
    %c0_14 = arith.constant 0 : index
    %64 = vector.load %arg7[%c8, %c0_14] : memref<36x256xf32, #tpu.memory_space<vmem>>, vector<4x256xf32>
    tpu.vector_store %arg7[%c8, %c0_14], %63 {strides = array<i32>} : memref<36x256xf32, #tpu.memory_space<vmem>>, vector<4x256xf32>,
    %c20 = arith.constant 20 : index
    %c0_15 = arith.constant 0 : index
    %65 = vector.load %arg7[%c20, %c0_15] : memref<36x256xf32, #tpu.memory_space<vmem>>, vector<4x256xf32>
    tpu.vector_store %arg7[%c20, %c0_15], %34 {strides = array<i32>} : memref<36x256xf32, #tpu.memory_space<vmem>>, vector<4x256xf32>,
    %66 = arith.select %26, %62, %59 : vector<4x256xi1>, vector<4x256xf32>
    %c32 = arith.constant 32 : index
    %c0_16 = arith.constant 0 : index
    %67 = vector.load %arg7[%c32, %c0_16] : memref<36x256xf32, #tpu.memory_space<vmem>>, vector<4x256xf32>
    tpu.vector_store %arg7[%c32, %c0_16], %66 {strides = array<i32>} : memref<36x256xf32, #tpu.memory_space<vmem>>, vector<4x256xf32>,
    %c0_17 = arith.constant 0 : index
    %c0_18 = arith.constant 0 : index
    %68 = vector.load %arg2[%c0_17, %c0_18] : memref<4x36xf32, #tpu.memory_space<vmem>>, vector<4x36xf32>
    %c0_19 = arith.constant 0 : index
    %c0_20 = arith.constant 0 : index
    %69 = vector.load %arg7[%c0_19, %c0_20] : memref<36x256xf32, #tpu.memory_space<vmem>>, vector<36x256xf32>
    %cst = arith.constant dense<0.000000e+00> : vector<4x256xf32>
    %70 = tpu.matmul %68, %69, %cst {dimension_numbers = #tpu.dot_dimension_numbers<[1], [0], [0], [1], [0, 0, 1, 1], [], []>, precision = #tpu.contract_precision<fp32>} : vector<4x36xf32>, vector<36x256xf32>, vector<4x256xf32> -> vector<4x256xf32>
    %c0_21 = arith.constant 0 : index
    %c0_22 = arith.constant 0 : index
    %71 = vector.load %arg3[%c0_21, %c0_22] : memref<4x1xf32, #tpu.memory_space<vmem>>, vector<4x1xf32>
    %72 = vector.broadcast %71 : vector<4x1xf32> to vector<4x256xf32>
    %73 = arith.addf %70, %72 : vector<4x256xf32>
    %cst_23 = arith.constant dense<0.000000e+00> : vector<4xf32>
    %74 = vector.multi_reduction <add>, %73, %cst_23 [1] : vector<4x256xf32> to vector<4xf32>
    %75 = vector.shape_cast %74 : vector<4xf32> to vector<4x1xf32>
    %76 = arith.mulf %73, %73 : vector<4x256xf32>
    %cst_24 = arith.constant dense<0.000000e+00> : vector<4xf32>
    %77 = vector.multi_reduction <add>, %76, %cst_24 [1] : vector<4x256xf32> to vector<4xf32>
    %78 = vector.shape_cast %77 : vector<4xf32> to vector<4x1xf32>
    %cst_25 = arith.constant 3.906250e-03 : f32
    %79 = vector.broadcast %cst_25 : f32 to vector<4x1xf32>
    %80 = arith.mulf %75, %79 : vector<4x1xf32>
    %cst_26 = arith.constant 3.906250e-03 : f32
    %81 = vector.broadcast %cst_26 : f32 to vector<4x1xf32>
    %82 = arith.mulf %78, %81 : vector<4x1xf32>
    %83 = arith.mulf %80, %80 : vector<4x1xf32>
    %84 = arith.subf %82, %83 : vector<4x1xf32>
    %cst_27 = arith.constant 0.000000e+00 : f32
    %85 = vector.broadcast %cst_27 : f32 to vector<4x1xf32>
    %86 = arith.maximumf %84, %85 : vector<4x1xf32>
    %87 = vector.broadcast %80 : vector<4x1xf32> to vector<4x256xf32>
    %88 = arith.subf %73, %87 : vector<4x256xf32>
    %cst_28 = arith.constant 9.99999974E-6 : f32
    %89 = vector.broadcast %cst_28 : f32 to vector<4x1xf32>
    %90 = arith.addf %86, %89 : vector<4x1xf32>
    %91 = math.rsqrt %90 : vector<4x1xf32>
    %92 = vector.broadcast %91 : vector<4x1xf32> to vector<4x256xf32>
    %93 = arith.mulf %88, %92 : vector<4x256xf32>
    %cst_29 = arith.constant 0.000000e+00 : f32
    %94 = vector.broadcast %cst_29 : f32 to vector<4x256xf32>
    %95 = arith.maximumf %93, %94 : vector<4x256xf32>
    %96 = vector.extract_strided_slice %95 {offsets = [0, 1], sizes = [4, 255], strides = [1, 1]} : vector<4x256xf32> to vector<4x255xf32>
    %97 = vector.extract_strided_slice %95 {offsets = [0, 0], sizes = [4, 1], strides = [1, 1]} : vector<4x256xf32> to vector<4x1xf32>
    %98 = tpu.concatenate %96, %97 in 1 : vector<4x255xf32>, vector<4x1xf32> -> vector<4x256xf32>
    %99 = vector.extract_strided_slice %95 {offsets = [0, 255], sizes = [4, 1], strides = [1, 1]} : vector<4x256xf32> to vector<4x1xf32>
    %100 = vector.extract_strided_slice %95 {offsets = [0, 0], sizes = [4, 255], strides = [1, 1]} : vector<4x256xf32> to vector<4x255xf32>
    %101 = tpu.concatenate %99, %100 in 1 : vector<4x1xf32>, vector<4x255xf32> -> vector<4x256xf32>
    %102 = arith.select %20, %98, %101 : vector<4x256xi1>, vector<4x256xf32>
    %103 = arith.select %22, %101, %98 : vector<4x256xi1>, vector<4x256xf32>
    %104 = vector.extract_strided_slice %102 {offsets = [0, 16], sizes = [4, 240], strides = [1, 1]} : vector<4x256xf32> to vector<4x240xf32>
    %105 = vector.extract_strided_slice %102 {offsets = [0, 0], sizes = [4, 16], strides = [1, 1]} : vector<4x256xf32> to vector<4x16xf32>
    %106 = tpu.concatenate %104, %105 in 1 : vector<4x240xf32>, vector<4x16xf32> -> vector<4x256xf32>
    %107 = vector.extract_strided_slice %102 {offsets = [0, 240], sizes = [4, 16], strides = [1, 1]} : vector<4x256xf32> to vector<4x16xf32>
    %108 = vector.extract_strided_slice %102 {offsets = [0, 0], sizes = [4, 240], strides = [1, 1]} : vector<4x256xf32> to vector<4x240xf32>
    %109 = tpu.concatenate %107, %108 in 1 : vector<4x16xf32>, vector<4x240xf32> -> vector<4x256xf32>
    %110 = arith.select %24, %106, %109 : vector<4x256xi1>, vector<4x256xf32>
    %c0_30 = arith.constant 0 : index
    %c0_31 = arith.constant 0 : index
    %111 = vector.load %arg7[%c0_30, %c0_31] : memref<36x256xf32, #tpu.memory_space<vmem>>, vector<4x256xf32>
    tpu.vector_store %arg7[%c0_30, %c0_31], %110 {strides = array<i32>} : memref<36x256xf32, #tpu.memory_space<vmem>>, vector<4x256xf32>,
    %c12_32 = arith.constant 12 : index
    %c0_33 = arith.constant 0 : index
    %112 = vector.load %arg7[%c12_32, %c0_33] : memref<36x256xf32, #tpu.memory_space<vmem>>, vector<4x256xf32>
    tpu.vector_store %arg7[%c12_32, %c0_33], %102 {strides = array<i32>} : memref<36x256xf32, #tpu.memory_space<vmem>>, vector<4x256xf32>,
    %113 = arith.select %26, %109, %106 : vector<4x256xi1>, vector<4x256xf32>
    %c24_34 = arith.constant 24 : index
    %c0_35 = arith.constant 0 : index
    %114 = vector.load %arg7[%c24_34, %c0_35] : memref<36x256xf32, #tpu.memory_space<vmem>>, vector<4x256xf32>
    tpu.vector_store %arg7[%c24_34, %c0_35], %113 {strides = array<i32>} : memref<36x256xf32, #tpu.memory_space<vmem>>, vector<4x256xf32>,
    %115 = vector.extract_strided_slice %95 {offsets = [0, 16], sizes = [4, 240], strides = [1, 1]} : vector<4x256xf32> to vector<4x240xf32>
    %116 = vector.extract_strided_slice %95 {offsets = [0, 0], sizes = [4, 16], strides = [1, 1]} : vector<4x256xf32> to vector<4x16xf32>
    %117 = tpu.concatenate %115, %116 in 1 : vector<4x240xf32>, vector<4x16xf32> -> vector<4x256xf32>
    %118 = vector.extract_strided_slice %95 {offsets = [0, 240], sizes = [4, 16], strides = [1, 1]} : vector<4x256xf32> to vector<4x16xf32>
    %119 = vector.extract_strided_slice %95 {offsets = [0, 0], sizes = [4, 240], strides = [1, 1]} : vector<4x256xf32> to vector<4x240xf32>
    %120 = tpu.concatenate %118, %119 in 1 : vector<4x16xf32>, vector<4x240xf32> -> vector<4x256xf32>
    %121 = arith.select %24, %117, %120 : vector<4x256xi1>, vector<4x256xf32>
    %c4_36 = arith.constant 4 : index
    %c0_37 = arith.constant 0 : index
    %122 = vector.load %arg7[%c4_36, %c0_37] : memref<36x256xf32, #tpu.memory_space<vmem>>, vector<4x256xf32>
    tpu.vector_store %arg7[%c4_36, %c0_37], %121 {strides = array<i32>} : memref<36x256xf32, #tpu.memory_space<vmem>>, vector<4x256xf32>,
    %c16_38 = arith.constant 16 : index
    %c0_39 = arith.constant 0 : index
    %123 = vector.load %arg7[%c16_38, %c0_39] : memref<36x256xf32, #tpu.memory_space<vmem>>, vector<4x256xf32>
    tpu.vector_store %arg7[%c16_38, %c0_39], %95 {strides = array<i32>} : memref<36x256xf32, #tpu.memory_space<vmem>>, vector<4x256xf32>,
    %124 = arith.select %26, %120, %117 : vector<4x256xi1>, vector<4x256xf32>
    %c28_40 = arith.constant 28 : index
    %c0_41 = arith.constant 0 : index
    %125 = vector.load %arg7[%c28_40, %c0_41] : memref<36x256xf32, #tpu.memory_space<vmem>>, vector<4x256xf32>
    tpu.vector_store %arg7[%c28_40, %c0_41], %124 {strides = array<i32>} : memref<36x256xf32, #tpu.memory_space<vmem>>, vector<4x256xf32>,
    %126 = vector.extract_strided_slice %103 {offsets = [0, 16], sizes = [4, 240], strides = [1, 1]} : vector<4x256xf32> to vector<4x240xf32>
    %127 = vector.extract_strided_slice %103 {offsets = [0, 0], sizes = [4, 16], strides = [1, 1]} : vector<4x256xf32> to vector<4x16xf32>
    %128 = tpu.concatenate %126, %127 in 1 : vector<4x240xf32>, vector<4x16xf32> -> vector<4x256xf32>
    %129 = vector.extract_strided_slice %103 {offsets = [0, 240], sizes = [4, 16], strides = [1, 1]} : vector<4x256xf32> to vector<4x16xf32>
    %130 = vector.extract_strided_slice %103 {offsets = [0, 0], sizes = [4, 240], strides = [1, 1]} : vector<4x256xf32> to vector<4x240xf32>
    %131 = tpu.concatenate %129, %130 in 1 : vector<4x16xf32>, vector<4x240xf32> -> vector<4x256xf32>
    %132 = arith.select %24, %128, %131 : vector<4x256xi1>, vector<4x256xf32>
    %c8_42 = arith.constant 8 : index
    %c0_43 = arith.constant 0 : index
    %133 = vector.load %arg7[%c8_42, %c0_43] : memref<36x256xf32, #tpu.memory_space<vmem>>, vector<4x256xf32>
    tpu.vector_store %arg7[%c8_42, %c0_43], %132 {strides = array<i32>} : memref<36x256xf32, #tpu.memory_space<vmem>>, vector<4x256xf32>,
    %c20_44 = arith.constant 20 : index
    %c0_45 = arith.constant 0 : index
    %134 = vector.load %arg7[%c20_44, %c0_45] : memref<36x256xf32, #tpu.memory_space<vmem>>, vector<4x256xf32>
    tpu.vector_store %arg7[%c20_44, %c0_45], %103 {strides = array<i32>} : memref<36x256xf32, #tpu.memory_space<vmem>>, vector<4x256xf32>,
    %135 = arith.select %26, %131, %128 : vector<4x256xi1>, vector<4x256xf32>
    %c32_46 = arith.constant 32 : index
    %c0_47 = arith.constant 0 : index
    %136 = vector.load %arg7[%c32_46, %c0_47] : memref<36x256xf32, #tpu.memory_space<vmem>>, vector<4x256xf32>
    tpu.vector_store %arg7[%c32_46, %c0_47], %135 {strides = array<i32>} : memref<36x256xf32, #tpu.memory_space<vmem>>, vector<4x256xf32>,
    %c0_48 = arith.constant 0 : index
    %c0_49 = arith.constant 0 : index
    %137 = vector.load %arg4[%c0_48, %c0_49] : memref<4x36xf32, #tpu.memory_space<vmem>>, vector<4x36xf32>
    %c0_50 = arith.constant 0 : index
    %c0_51 = arith.constant 0 : index
    %138 = vector.load %arg7[%c0_50, %c0_51] : memref<36x256xf32, #tpu.memory_space<vmem>>, vector<36x256xf32>
    %cst_52 = arith.constant dense<0.000000e+00> : vector<4x256xf32>
    %139 = tpu.matmul %137, %138, %cst_52 {dimension_numbers = #tpu.dot_dimension_numbers<[1], [0], [0], [1], [0, 0, 1, 1], [], []>, precision = #tpu.contract_precision<fp32>} : vector<4x36xf32>, vector<36x256xf32>, vector<4x256xf32> -> vector<4x256xf32>
    %c0_53 = arith.constant 0 : index
    %c0_54 = arith.constant 0 : index
    %140 = vector.load %arg5[%c0_53, %c0_54] : memref<4x1xf32, #tpu.memory_space<vmem>>, vector<4x1xf32>
    %141 = vector.broadcast %140 : vector<4x1xf32> to vector<4x256xf32>
    %142 = arith.addf %139, %141 : vector<4x256xf32>
    %cst_55 = arith.constant dense<0.000000e+00> : vector<4xf32>
    %143 = vector.multi_reduction <add>, %142, %cst_55 [1] : vector<4x256xf32> to vector<4xf32>
    %144 = vector.shape_cast %143 : vector<4xf32> to vector<4x1xf32>
    %145 = arith.mulf %142, %142 : vector<4x256xf32>
    %cst_56 = arith.constant dense<0.000000e+00> : vector<4xf32>
    %146 = vector.multi_reduction <add>, %145, %cst_56 [1] : vector<4x256xf32> to vector<4xf32>
    %147 = vector.shape_cast %146 : vector<4xf32> to vector<4x1xf32>
    %cst_57 = arith.constant 3.906250e-03 : f32
    %148 = vector.broadcast %cst_57 : f32 to vector<4x1xf32>
    %149 = arith.mulf %144, %148 : vector<4x1xf32>
    %cst_58 = arith.constant 3.906250e-03 : f32
    %150 = vector.broadcast %cst_58 : f32 to vector<4x1xf32>
    %151 = arith.mulf %147, %150 : vector<4x1xf32>
    %152 = arith.mulf %149, %149 : vector<4x1xf32>
    %153 = arith.subf %151, %152 : vector<4x1xf32>
    %cst_59 = arith.constant 0.000000e+00 : f32
    %154 = vector.broadcast %cst_59 : f32 to vector<4x1xf32>
    %155 = arith.maximumf %153, %154 : vector<4x1xf32>
    %156 = vector.broadcast %149 : vector<4x1xf32> to vector<4x256xf32>
    %157 = arith.subf %142, %156 : vector<4x256xf32>
    %cst_60 = arith.constant 9.99999974E-6 : f32
    %158 = vector.broadcast %cst_60 : f32 to vector<4x1xf32>
    %159 = arith.addf %155, %158 : vector<4x1xf32>
    %160 = math.rsqrt %159 : vector<4x1xf32>
    %161 = vector.broadcast %160 : vector<4x1xf32> to vector<4x256xf32>
    %162 = arith.mulf %157, %161 : vector<4x256xf32>
    %163 = arith.addf %1, %162 : vector<4x256xf32>
    %c0_61 = arith.constant 0 : index
    %c0_62 = arith.constant 0 : index
    %c0_63 = arith.constant 0 : index
    %164 = vector.load %arg6[%c0_61, %c0_62, %c0_63] : memref<1x4x256xf32, #tpu.memory_space<vmem>>, vector<1x4x256xf32>
    %165 = vector.shape_cast %164 : vector<1x4x256xf32> to vector<4x256xf32>
    %166 = vector.shape_cast %163 : vector<4x256xf32> to vector<1x4x256xf32>
    tpu.vector_store %arg6[%c0_61, %c0_62, %c0_63], %166 {strides = array<i32>} : memref<1x4x256xf32, #tpu.memory_space<vmem>>, vector<1x4x256xf32>,
    return
  }
  func.func @transform_0(%arg0: i32) -> (i32, i32, i32) {
    %c0_i32 = arith.constant 0 : i32
    %c0_i32_0 = arith.constant 0 : i32
    %c0_i32_1 = arith.constant 0 : i32
    return %arg0, %c0_i32, %c0_i32_0 : i32, i32, i32
  }
  func.func @transform_1(%arg0: i32) -> (i32, i32) {
    %c0_i32 = arith.constant 0 : i32
    %c0_i32_0 = arith.constant 0 : i32
    %c0_i32_1 = arith.constant 0 : i32
    return %c0_i32, %c0_i32_0 : i32, i32
  }
  func.func @transform_2(%arg0: i32) -> (i32, i32) {
    %c0_i32 = arith.constant 0 : i32
    %c0_i32_0 = arith.constant 0 : i32
    %c0_i32_1 = arith.constant 0 : i32
    return %c0_i32, %c0_i32_0 : i32, i32
  }
  func.func @transform_3(%arg0: i32) -> (i32, i32) {
    %c0_i32 = arith.constant 0 : i32
    %c0_i32_0 = arith.constant 0 : i32
    %c0_i32_1 = arith.constant 0 : i32
    return %c0_i32, %c0_i32_0 : i32, i32
  }
  func.func @transform_4(%arg0: i32) -> (i32, i32) {
    %c0_i32 = arith.constant 0 : i32
    %c0_i32_0 = arith.constant 0 : i32
    %c0_i32_1 = arith.constant 0 : i32
    return %c0_i32, %c0_i32_0 : i32, i32
  }
  func.func @transform_5(%arg0: i32) -> (i32, i32, i32) {
    %c0_i32 = arith.constant 0 : i32
    %c0_i32_0 = arith.constant 0 : i32
    %c0_i32_1 = arith.constant 0 : i32
    return %arg0, %c0_i32, %c0_i32_0 : i32, i32, i32
  }
}

</mosaic_0001>

<bundles_post_ra>
// kernel: tpu_custom_call.1
= control target key start
LH: loop header
LB: loop body
LE: loop exit
PB: predicated region body
PF: predicated region fallthrough
CT: control target
= control target key end

     0   :  { %10 = vsyncpa [#allocation4], 0  ;;  %s2797_s0 = inlined_call_operand.hbm [shape: f32[2,4,256], index: 0, kind: input, shape index: {}]   ;;  %s2798_s1 = inlined_call_operand.vmem [shape: f32[4,36], index: 1, kind: input, shape index: {}]   ;;  %s2799_s2 = inlined_call_operand.vmem [shape: f32[4,1], index: 2, kind: input, shape index: {}]   ;;  %s2800_s3 = inlined_call_operand.vmem [shape: f32[4,36], index: 3, kind: input, shape index: {}]   ;;  %s2801_s4 = inlined_call_operand.vmem [shape: f32[4,1], index: 4, kind: input, shape index: {}]   ;;  %s2802_s5 = inlined_call_operand.hbm [shape: f32[2,4,256], index: 5, kind: output, shape index: {}]  }
   0x1   :  { %12 = vsyncpa [#allocation4 + $0x1], 0 }
   0x2   :  { %13 = vsyncpa [#allocation5], 0 }
   0x3   :  { %15 = vsyncpa [#allocation5 + $0x1], 0  ;;  %s2207_s18 = smov 0   ;;  %s2209_s19 = smov 0  }
   0x4   :  { %s2211_s20 = smov 0   ;;  %s2213_s21 = smov 0  }
   0x5 LB: > { %s2228_s22 = sadd.s32 4294967295, %s2167_s21   ;;  %s1877_s23 = sadd.s32 4294967294, %s2167_s21   ;;  %s2167_s21 = sphi %s2213_s21, %s2825_s21   ;;  %s2163_s20 = sphi %s2211_s20, %s2824_s20   ;;  %s2159_s19 = sphi %s2209_s19, %s2823_s19   ;;  %s2155_s18 = sphi %s2207_s18, %s2822_s18  }
   0x6   : > { %s2232_s24 = sadd.s32 1, %s2167_s21   ;;  %s28_s25 = sadd.s32 1, %s2163_s20 }
   0x7   : > { %s25_s26 = ssub.s32 %s2167_s21, %s2232_s24  ;;  %p35_p0 = scmp.ne.s32.totalorder %s2163_s20, %s2159_s19 }
   0x8   : > { %p26_p1 = scmp.eq.s32.totalorder %s25_s26, 0  ;;  %p36_p2 = scmp.eq.s32.totalorder %s2167_s21, 0 }
   0x9   : > { %p41_p3 = scmp.ne.s32.totalorder %s2159_s19, %s2155_s18  ;;  %p42_p4 = scmp.eq.s32.totalorder %s2228_s22, 0 }
   0xa   : > { %s2244_s27 = scalar_select %p26_p1, %s2163_s20, %s28_s25  }
   0xb   : > { %p2246_p5 = por %p36_p2, %p35_p0  ;;  %p2250_p6 = por %p42_p4, %p41_p3 }
   0xc   : > { %p149_p7 = scmp.eq.s32.totalorder %s2228_s22, 1  ;;  %p155_p8 = scmp.eq.s32.totalorder %s1877_s23, 1 }
   0xd   : > { %p2025_p10 = scmp.lt.s32.totalorder %s2167_s21, 2  ;;  %s187_s7 = sand.u32 1, %s2163_s20  }
   0xe   : > { %p2257_p11 = por %p149_p7, %p35_p0  ;;  %p2261_p12 = por %p155_p8, %p41_p3 }
   0xf   : > { %s1891_s8 = sshll.u32 %s2167_s21, 7  ;;  %s1880_s9 = sshll.u32 %s187_s7, 3 }
  0x10   : > { %s2806_s30 = scalar_select %p2257_p11, 1, 0 }
  0x11   : > { %s2807_s6 = scalar_select %p2261_p12, 1, 0 }
  0x12   : > { %s2270_s12 = scalar_lea.hbm %s2797_s0, %s1891_s8  ;;  %s191_s13 = scalar_lea.vmem [#allocation3], %s1880_s9 }
  0x13   : > { %s199_s14 = sshll.u32 %s191_s13, 4  ;;  %p2274_p13 = pnand %p2025_p10, %p2246_p5  ;;  %s2278_s14 = int_to_ptr.vmem [resolvable:$true] %s199_s14 }
  0x14   : > { %s188_s16 = scalar_lea.sflag [#allocation4], %s187_s7  ;;  %s2071_s17 = scalar_lea.hbm %s2270_s12, 128 }
  0x15   : > { %p2072_p2 = scmp.ne.s32.totalorder %s2270_s12, %s2071_s17  ;;  %p2073_p3 = pneg %p2274_p13 }
  0x16   : > { %s2076_s26 = scalar_lea.hbm %s2797_s0, 256  ;;  %p2077_p5 = scmp.lt.u32.totalorder %s2270_s12, %s2797_s0 }
  0x17   : > { %p2074_p4 = pnand %p2073_p3, %p2072_p2  ;;  %p2078_p8 = scmp.lt.u32.totalorder %s2076_s26, %s2071_s17 }
  0x18   : > { %p2080_p9 = scmp.lt.u32.totalorder %s2071_s17, %s2270_s12 }
  0x19   : > { %p2075_p7 = pneg %p2074_p4  ;;  %p2079_p10 = por %p2078_p8, %p2077_p5 }
  0x1b   : > { %p2081_p0 = por %p2080_p9, %p2079_p10 }
  0x1d   : > { %p2082_p1 = pnand %p2081_p0, %p2075_p7 }
  0x1f   : > { %2085 = shalt.err (!%p2082_p1)
}
  0x20   : > { %s2086_s7 = scalar_lea.vmem %s2278_s14, 128  ;;  %s2169_s9 = smov [#allocation3]  }
  0x21   : > { %p2087_p2 = scmp.ne.s32.totalorder %s2278_s14, %s2086_s7  ;;  %s2091_s10 = sshll.u32 %s2169_s9, 4  ;;  %s2092_s10 = int_to_ptr.vmem [resolvable:$false] %s2091_s10 }
  0x22   : > { %s2093_s11 = scalar_lea.vmem %s2092_s10, 256  ;;  %p2094_p11 = scmp.lt.s32.totalorder %s2278_s14, %s2092_s10 }
  0x23   : > { %p2089_p4 = pnand %p2087_p2, %p2073_p3  ;;  %p2095_p5 = scmp.lt.s32.totalorder %s2093_s11, %s2086_s7 }
  0x25   : > { %p2090_p12 = pneg %p2089_p4  ;;  %p2096_p8 = por %p2095_p5, %p2094_p11 }
  0x27   : > { %p2097_p9 = pnand %p2096_p8, %p2090_p12 }
  0x29   : > { %2100 = shalt.err (!%p2097_p9)
}
  0x2a   : > { %2020 = dma.hbm_to_vmem [thread:$0]  (!%p2274_p13), %s2270_s12, 128, %s2278_s14, %s188_s16  }
  0x2b   : > { %p2809_p0 = scmp.lt.s32.totalorder %s2167_s21, 3  ;;  %p2810_p1 = scmp.ge.s32.totalorder %s2167_s21, 1 }
  0x2d   : > { %p205_p3 = pnand %p2810_p1, %p2809_p0 }
  0x2e   : > { %s2312_s13 = sand.u32 (!%p205_p3), 1, %s2159_s19  }
  0x2f   : > { %208 = sbr.rel (%p205_p3) target bundleno = 1490 (0x5d2), region = 40  ;;  %s1884_s17 = sshll.u32 (!%p205_p3), %s2312_s13, 3 }
  0x30   : > { %s211_s23 = scalar_lea.sflag (!%p205_p3), [#allocation4], %s2312_s13  ;;  %s214_s15 = scalar_lea.vmem (!%p205_p3), [#allocation3], %s1884_s17 }
  0x36   : > { %2146 = dma.done.wait (%p2250_p6), %s211_s23, 128  }
  0x37   : > { %2148 = vsyncadd (%p2250_p6), %s211_s23, 4294967168  ;;  %v2322_v0 = vld [vmem:[%s214_s15] sm:$0xff]  ;;  %s2170_s12 = smov 127   ;;  %s2171_s14 = smov 1   ;;  %v242_v2 = vlaneseq  ;;  %vm283_vm0 = vcmask 1039360   ;;  %vm294_vm1 = vcmask 7168  }
  0x38   : > { %279 = vrot.lane.b32.xlu0 %v2322_v0, %s2170_s12  ;;  %368 = vst [vmem:[#allocation2 + $0x20] sm:$0xf] %v2322_v0  ;;  %v278_v1 = vcombine.high %v2322_v0, %v2322_v0  ;;  %s2172_s29 = smov 112   ;;  %s2173_s16 = smov 16   ;;  %vm309_vm6 = vcmask 916480   ;;  %vm320_vm7 = vcmask 130048  }
  0x39   : > { %v2339_v3 = vand.u32 127, %v242_v2  ;;  %v2174_v41 = vmov 0.0   ;;  %v425_v42 = vld [vmem:[%s2799_s2] sm:$0xf]  ;;  %v2175_v43 = vmov 0   ;;  %vm431_vm10 = vcmask 293888  }
  0x3a   : > { %289 = vrot.lane.b32.xlu1 %v278_v1, %s2171_s14  ;;  %369 = vst [vmem:[#allocation2 + $0x28] sm:$0xf] %v278_v1  ;;  %516 = vmatprep.mubr.f32.mxu0 %v2174_v41  ;;  %v414_v56 = vld [vmem:[%s2798_s1] sm:$0xf]  ;;  %vm435_vm11 = vcmask 1043456   ;;  %s1892_s23 = sshll.u32 %s2228_s22, 7 }
  0x3b   : > { %v2342_v4 = vadd.s32 128, %v2339_v3  ;;  %v249_v7 = vand.u32 15, %v2339_v3  ;;  %vm273_vm9 = vcmp.lt.s32.totalorder %v2339_v3, 16  ;;  %1268 = vmatprep.mubr.f32.mxu1 %v2174_v41  ;;  %2065 = vset.pattern.permute.xlu0 %v2175_v43  ;;  %v433_v58 = vsel %vm431_vm10, %v414_v56, 0  ;;  %s240_s15 = scalar_lea.vmem [#allocation6], %s1884_s17  ;;  %s1793_s25 = scalar_lea.sflag [#allocation5], %s2312_s13 }
  0x3c   : > { %281 = vrot.lane.b32.xlu0 %v278_v1, %s2170_s12  ;;  %p2819_p11 = scmp.ne.s32.totalorder %s2806_s30, 0  ;;  %s2176_s22 = smov [#allocation6]  }
  0x3d   : > { %v256_v6 = vand.u32 15, %v2342_v4  ;;  %vm2350_vm3 = vcmp.eq.s32.totalorder %v249_v7, 0  ;;  %vm2358_vm5 = vcmp.eq.s32.totalorder %v249_v7, 15  ;;  %vm276_vm8 = vcmp.ge.s32.totalorder %v2342_v4, 240  ;;  %s2105_s17 = sshll.u32 %s2176_s22, 4  ;;  %s2106_s17 = int_to_ptr.vmem [resolvable:$false] %s2105_s17 }
  0x3e   : > { %292 = vrot.lane.b32.xlu1 %v2322_v0, %s2171_s14  ;;  %s2107_s28 = scalar_lea.vmem %s2106_s17, 256 }
  0x3f   : > { %vm2346_vm2 = vcmp.eq.s32.totalorder %v256_v6, 0  ;;  %vm2354_vm4 = vcmp.eq.s32.totalorder %v256_v6, 15 }
  0x40   : > { %339 = vrot.lane.b32.xlu0 %v2322_v0, %s2172_s29 }
  0x42   : > { %341 = vrot.lane.b32.xlu1 %v278_v1, %s2172_s29 }
  0x44   : > { %348 = vrot.lane.b32.xlu0 %v278_v1, %s2173_s16 }
  0x46   : > { %351 = vrot.lane.b32.xlu1 %v2322_v0, %s2173_s16 }
  0xaa   : > { %v280_v5 = vpop.permute.xlu0 %279 }
  0xac   : > { %v290_v8 = vpop.permute.xlu1 %289 }
  0xae   : > { %v282_v9 = vpop.permute.xlu0 %281 }
  0xaf   : > { %v284_v15 = vsel %vm283_vm0, %v280_v5, %v282_v9  ;;  %v288_v16 = vsel %vm283_vm0, %v282_v9, %v280_v5 }
  0xb0   : > { %v293_v14 = vpop.permute.xlu1 %292 }
  0xb1   : > { %v295_v17 = vsel %vm294_vm1, %v293_v14, %v290_v8  ;;  %v298_v18 = vsel %vm294_vm1, %v290_v8, %v293_v14  ;;  %v2417_v8 = vand.u32 4294901760, %v433_v58 }
  0xb2   : > { %v300_v19 = vsel %vm2346_vm2, %v288_v16, %v295_v17  ;;  %v299_v20 = vsel %vm2350_vm3, %v284_v15, %v298_v18  ;;  %v302_v21 = vsel %vm2354_vm4, %v295_v17, %v288_v16  ;;  %v301_v22 = vsel %vm2358_vm5, %v298_v18, %v284_v15  ;;  %v340_v23 = vpop.permute.xlu0 %339 }
  0xb3   : > { %307 = vrot.lane.b32.xlu1 %v300_v19, %s2172_s29  ;;  %v330_v24 = vrot.slane %v300_v19, 4  ;;  %305 = vrot.lane.b32.xlu0 %v299_v20, %s2172_s29  ;;  %v329_v25 = vrot.slane %v299_v20, 4  ;;  %v405_v26 = vrot.slane %v302_v21, 4  ;;  %v404_v27 = vrot.slane %v301_v22, 4 }
  0xb4   : > { %v342_v28 = vpop.permute.xlu1 %341 }
  0xb5   : > { %334 = vst [vmem:[#allocation2 + $0x18] sm:$0xf0] %v330_v24  ;;  %333 = vst [vmem:[#allocation2 + $0x10] sm:$0xf0] %v329_v25  ;;  %v343_v29 = vsel %vm309_vm6, %v340_v23, %v342_v28  ;;  %v347_v32 = vsel %vm309_vm6, %v342_v28, %v340_v23 }
  0xb6   : > { %409 = vst [vmem:[#allocation2 + $0x28] sm:$0xf0] %v405_v26  ;;  %408 = vst [vmem:[#allocation2 + $0x20] sm:$0xf0] %v404_v27  ;;  %v374_v30 = vrot.slane %v343_v29, 4  ;;  %v349_v31 = vpop.permute.xlu0 %348 }
  0xb7   : > { %318 = vrot.lane.b32.xlu1 %v299_v20, %s2173_s16  ;;  %315 = vrot.lane.b32.xlu0 %v300_v19, %s2173_s16 }
  0xb8   : > { %378 = vst [vmem:[#allocation2 + $0x30] sm:$0xf0] %v374_v30  ;;  %v352_v33 = vpop.permute.xlu1 %351 }
  0xb9   : > { %v353_v34 = vsel %vm320_vm7, %v352_v33, %v349_v31  ;;  %v356_v35 = vsel %vm320_vm7, %v349_v31, %v352_v33 }
  0xba   : > { %v357_v36 = vsel %vm273_vm9, %v343_v29, %v356_v35  ;;  %v362_v37 = vrot.slane %v353_v34, 4  ;;  %v371_v38 = vsel %vm276_vm8, %v353_v34, %v347_v32 }
  0xbb   : > { %384 = vrot.lane.b32.xlu1 %v302_v21, %s2172_s29  ;;  %382 = vrot.lane.b32.xlu0 %v301_v22, %s2172_s29  ;;  %v361_v39 = vrot.slane %v357_v36, 4  ;;  %v375_v40 = vrot.slane %v371_v38, 4 }
  0xbc   : > { %366 = vst [vmem:[#allocation2 + $0x8] sm:$0xf0] %v362_v37 }
  0xbd   : > { %365 = vst [vmem:[#allocation2] sm:$0xf0] %v361_v39  ;;  %379 = vst [vmem:[#allocation2 + $0x38] sm:$0xf0] %v375_v40  ;;  %v420_v14 = vld [vmem:[#allocation2 + $0x28] sm:$0xff]  ;;  %v419_v19 = vld [vmem:[#allocation2 + $0x20] sm:$0xff] }
  0xbe   : > { %v450_v18 = vand.u32 4294901760, %v420_v14  ;;  %v452_v27 = vand.u32 4294901760, %v419_v19 }
  0xbf   : > { %394 = vrot.lane.b32.xlu1 %v301_v22, %s2173_s16  ;;  %391 = vrot.lane.b32.xlu0 %v302_v21, %s2173_s16  ;;  %v2420_v21 = vsub.f32 %v433_v58, %v2417_v8 }
  0xc0   : > { %v2428_v30 = vsub.f32 %v420_v14, %v450_v18 }
  0xc1   : > { %v519_v33 = vand.u32 4294901760, %v2420_v21 }
  0xc3   : > { %428 = vperm.xlu0 %2065, %v425_v42  }
 0x125   : > { %v308_v44 = vpop.permute.xlu1 %307  ;;  %v306_v45 = vpop.permute.xlu0 %305 }
 0x126   : > { %v310_v46 = vsel %vm309_vm6, %v306_v45, %v308_v44  ;;  %v314_v49 = vsel %vm309_vm6, %v308_v44, %v306_v45  ;;  %v2447_v45 = vsub.f32 %v419_v19, %v452_v27 }
 0x127   : > { %337 = vst [vmem:[#allocation2 + $0x30] sm:$0xf] %v310_v46 }
 0x129   : > { %v319_v47 = vpop.permute.xlu1 %318  ;;  %v316_v48 = vpop.permute.xlu0 %315 }
 0x12a   : > { %v321_v50 = vsel %vm320_vm7, %v319_v47, %v316_v48  ;;  %v324_v51 = vsel %vm320_vm7, %v316_v48, %v319_v47 }
 0x12b   : > { %v325_v52 = vsel %vm273_vm9, %v310_v46, %v324_v51  ;;  %328 = vst [vmem:[#allocation2 + $0x8] sm:$0xf] %v321_v50  ;;  %v336_v53 = vsel %vm276_vm8, %v321_v50, %v314_v49  ;;  %v554_v49 = vand.u32 4294901760, %v2428_v30  ;;  %v520_v51 = vsub.f32 %v2420_v21, %v519_v33 }
 0x12c   : > { %327 = vst [vmem:[#allocation2] sm:$0xf] %v325_v52  ;;  %338 = vst [vmem:[#allocation2 + $0x38] sm:$0xf] %v336_v53 }
 0x12d   : > { %v385_v54 = vpop.permute.xlu1 %384  ;;  %v383_v55 = vpop.permute.xlu0 %382 }
 0x12e   : > { %v386_v57 = vsel %vm309_vm6, %v383_v55, %v385_v54  ;;  %v390_v61 = vsel %vm309_vm6, %v385_v54, %v383_v55  ;;  %v421_v15 = vld [vmem:[#allocation2 + $0x30] sm:$0xff] }
 0x12f   : > { %412 = vst [vmem:[#allocation2 + $0x40] sm:$0xf] %v386_v57  ;;  %v456_v20 = vand.u32 4294901760, %v421_v15 }
 0x131   : > { %v395_v59 = vpop.permute.xlu1 %394  ;;  %v392_v60 = vpop.permute.xlu0 %391  ;;  %v2430_v31 = vsub.f32 %v421_v15, %v456_v20  ;;  %v2476_v58 = vpack.c.bf16 %v456_v20, %v452_v27 }
 0x132   : > { %v396_v62 = vsel %vm320_vm7, %v395_v59, %v392_v60  ;;  %v399_v63 = vsel %vm320_vm7, %v392_v60, %v395_v59  ;;  %v416_v1 = vld [vmem:[#allocation2 + $0x8] sm:$0xff] }
 0x133   : > { %v400_v2 = vsel %vm273_vm9, %v386_v57, %v399_v63  ;;  %403 = vst [vmem:[#allocation2 + $0x18] sm:$0xf] %v396_v62  ;;  %v411_v5 = vsel %vm276_vm8, %v396_v62, %v390_v61  ;;  %v415_v6 = vld [vmem:[#allocation2] sm:$0xff]  ;;  %v422_v7 = vld [vmem:[#allocation2 + $0x38] sm:$0xff]  ;;  %v442_v9 = vand.u32 4294901760, %v416_v1  ;;  %v572_v53 = vand.u32 4294901760, %v2430_v31 }
 0x134   : > { %402 = vst [vmem:[#allocation2 + $0x10] sm:$0xf] %v400_v2  ;;  %413 = vst [vmem:[#allocation2 + $0x48] sm:$0xf] %v411_v5  ;;  %v454_v16 = vand.u32 4294901760, %v422_v7  ;;  %v444_v17 = vand.u32 4294901760, %v415_v6  ;;  %v555_v63 = vsub.f32 %v2428_v30, %v554_v49 }
 0x135   : > { %v2422_v22 = vsub.f32 %v416_v1, %v442_v9  ;;  %v560_v61 = vand.u32 4294901760, %v2447_v45  ;;  %v573_v5 = vsub.f32 %v2430_v31, %v572_v53 }
 0x136   : > { %v2424_v23 = vsub.f32 %v422_v7, %v454_v16  ;;  %v423_v24 = vld [vmem:[#allocation2 + $0x40] sm:$0xf]  ;;  %v2426_v26 = vsub.f32 %v415_v6, %v444_v17  ;;  %v2451_v47 = vpack.c.bf16 %v454_v16, %v450_v18  ;;  %v521_v7 = vand.u32 4294901760, %v520_v51 }
 0x137   : > { %v437_v36 = vsel %vm435_vm11, %v423_v24, 0  ;;  %v530_v37 = vand.u32 4294901760, %v2422_v22  ;;  %v561_v16 = vsub.f32 %v2447_v45, %v560_v61  ;;  %v556_v18 = vand.u32 4294901760, %v555_v63 }
 0x138   : > { %v566_v42 = vand.u32 4294901760, %v2424_v23  ;;  %v536_v46 = vand.u32 4294901760, %v2426_v26  ;;  %v2456_v50 = vand.u32 4294901760, %v437_v36  ;;  %v574_v20 = vand.u32 4294901760, %v573_v5 }
 0x139   : > { %v531_v54 = vsub.f32 %v2422_v22, %v530_v37 }
 0x13a   : > { %v418_v25 = vld [vmem:[#allocation2 + $0x18] sm:$0xff]  ;;  %v567_v56 = vsub.f32 %v2424_v23, %v566_v42  ;;  %v537_v59 = vsub.f32 %v2426_v26, %v536_v46  ;;  %v583_v1 = vsub.f32 %v437_v36, %v2456_v50 }
 0x13b   : > { %v446_v28 = vand.u32 4294901760, %v418_v25  ;;  %v417_v29 = vld [vmem:[#allocation2 + $0x10] sm:$0xff]  ;;  %v424_v32 = vld [vmem:[#allocation2 + $0x48] sm:$0xf]  ;;  %v532_v6 = vand.u32 4294901760, %v531_v54  ;;  %v1913_v54 = vpack.c.bf16 %v2424_v23, %v2428_v30 }
 0x13c   : > { %v448_v34 = vand.u32 4294901760, %v417_v29  ;;  %v440_v35 = vsel %vm435_vm11, %v424_v32, 0  ;;  %v538_v15 = vand.u32 4294901760, %v537_v59  ;;  %v584_v24 = vand.u32 4294901760, %v583_v1 }
 0x13d   : > { %v2436_v38 = vpack.c.bf16 %v446_v28, %v442_v9  ;;  %v2438_v39 = vsub.f32 %v418_v25, %v446_v28  ;;  %v2440_v40 = vand.u32 4294901760, %v440_v35  ;;  %v568_v9 = vand.u32 4294901760, %v567_v56 }
 0x13e   : > { %v2443_v43 = vpack.c.bf16 %v448_v34, %v444_v17  ;;  %v2445_v44 = vsub.f32 %v417_v29, %v448_v34  ;;  %v562_v28 = vand.u32 4294901760, %v561_v16  ;;  %v585_v32 = vsub.f32 %v583_v1, %v584_v24 }
 0x13f   : > { %1894 = vmatprep.subr.bf16.mxu0 %v2436_v38  ;;  %v542_v48 = vand.u32 4294901760, %v2438_v39  ;;  %v2474_v57 = vsub.f32 %v440_v35, %v2440_v40  ;;  %v1905_v25 = vpack.c.bf16 %v568_v9, %v556_v18  ;;  %v1909_v36 = vpack.c.bf16 %v2438_v39, %v2422_v22 }
 0x140   : > { %1896 = vmatpush1.bf16.msra.mxu0 %v2443_v43  ;;  %v548_v52 = vand.u32 4294901760, %v2445_v44  ;;  %v1907_v29 = vpack.c.bf16 %v574_v20, %v562_v28  ;;  %v586_v35 = vand.u32 4294901760, %v585_v32  ;;  %v1911_v51 = vpack.c.bf16 %v2445_v44, %v2426_v26 }
 0x141   : > { %1898 = vmatprep.subr.bf16.mxu0 %v2451_v47  ;;  %v543_v55 = vsub.f32 %v2438_v39, %v542_v48  ;;  %v578_v14 = vand.u32 4294901760, %v2474_v57  ;;  %v1925_v56 = vpack.c.bf16 %v542_v48, %v530_v37  ;;  %v1929_v59 = vpack.c.bf16 %v566_v42, %v554_v49 }
 0x142   : > { %v549_v60 = vsub.f32 %v2445_v44, %v548_v52  ;;  %v1931_v22 = vpack.c.bf16 %v572_v53, %v560_v61 }
 0x143   : > { %v544_v62 = vand.u32 4294901760, %v543_v55  ;;  %v579_v27 = vsub.f32 %v2474_v57, %v578_v14  ;;  %v1915_v55 = vpack.c.bf16 %v2430_v31, %v2447_v45 }
 0x144   : > { %1900 = vmatpush1.bf16.msra.mxu0 %v2476_v58  ;;  %v550_v2 = vand.u32 4294901760, %v549_v60 }
 0x145   : > { %459 = vmatprep.subr.mxu0 %v2440_v40  ;;  %v1901_v17 = vpack.c.bf16 %v544_v62, %v532_v6  ;;  %v580_v34 = vand.u32 4294901760, %v579_v27 }
 0x146   : > { %v1903_v19 = vpack.c.bf16 %v550_v2, %v538_v15 }
 0x148   : > { %461 = vmatpush1.msra.mxu0 %v2456_v50 }
 0x149   : > { %1902 = vmatprep.subr.bf16.mxu0 %v1901_v17  ;;  %522 = vmatmul.mubr.f32.vlgmr.msra.gmra.mrb[0].mxu0 %v521_v7 }
 0x14a   : > { %1904 = vmatpush1.bf16.msra.mxu0 %v1903_v19  ;;  %642 = vmatprep.mubr.f32.mxu0 %v2174_v41 }
 0x14b   : > { %1906 = vmatprep.subr.bf16.mxu0 %v1905_v25 }
 0x14e   : > { %1908 = vmatpush1.bf16.msra.mxu0 %v1907_v29 }
 0x14f   : > { %581 = vmatprep.subr.mxu0 %v580_v34 }
 0x152   : > { %587 = vmatpush1.msra.mxu0 %v586_v35 }
 0x153   : > { %1910 = vmatprep.subr.bf16.mxu0 %v1909_v36  ;;  %644 = vmatmul.mubr.f32.vlgmr.msra.gmra.mrb[0].mxu0 %v2417_v8 }
 0x154   : > { %1912 = vmatpush1.bf16.msra.mxu0 %v1911_v51  ;;  %734 = vmatprep.mubr.f32.mxu0 %v2174_v41 }
 0x155   : > { %1914 = vmatprep.subr.bf16.mxu0 %v1913_v54 }
 0x158   : > { %1916 = vmatpush1.bf16.msra.mxu0 %v1915_v55 }
 0x159   : > { %676 = vmatprep.subr.mxu0 %v2474_v57  ;;  %v1927_v57 = vpack.c.bf16 %v548_v52, %v536_v46 }
 0x15c   : > { %679 = vmatpush1.msra.mxu0 %v583_v1 }
 0x15d   : > { %1918 = vmatprep.subr.bf16.mxu0 %v2436_v38  ;;  %737 = vmatmul.mubr.f32.vlgmr.msra.gmra.mrb[0].mxu0 %v2420_v21  ;;  %v429_v21 = vpop.permute.xlu0 %428 }
 0x15e   : > { %1920 = vmatpush1.bf16.msra.mxu0 %v2443_v43  ;;  %817 = vmatprep.mubr.f32.mxu0 %v2174_v41 }
 0x15f   : > { %1922 = vmatprep.subr.bf16.mxu0 %v2451_v47 }
 0x162   : > { %1924 = vmatpush1.bf16.msra.mxu0 %v2476_v58 }
 0x163   : > { %760 = vmatprep.subr.mxu0 %v2440_v40 }
 0x166   : > { %762 = vmatpush1.msra.mxu0 %v2456_v50 }
 0x167   : > { %1926 = vmatprep.subr.bf16.mxu0 %v1925_v56  ;;  %821 = vmatmul.mubr.f32.vlgmr.msra.gmra.mrb[0].mxu0 %v519_v33 }
 0x168   : > { %1928 = vmatpush1.bf16.msra.mxu0 %v1927_v57  ;;  %921 = vmatprep.mubr.f32.mxu0 %v2174_v41 }
 0x169   : > { %1930 = vmatprep.subr.bf16.mxu0 %v1929_v59  ;;  %v1179_v59 = vld [vmem:[%s2801_s4] sm:$0xf] }
 0x16c   : > { %1932 = vmatpush1.bf16.msra.mxu0 %v1931_v22 }
 0x16d   : > { %862 = vmatprep.subr.mxu0 %v578_v14 }
 0x170   : > { %866 = vmatpush1.msra.mxu0 %v584_v24 }
 0x171   : > { %1934 = vmatprep.subr.bf16.mxu0 %v2436_v38  ;;  %923 = vmatmul.mubr.f32.vlgmr.msra.gmra.mrb[0].mxu0 %v2417_v8 }
 0x172   : > { %1936 = vmatpush1.bf16.msra.mxu0 %v2443_v43  ;;  %1003 = vmatprep.mubr.f32.mxu0 %v2174_v41 }
 0x173   : > { %1938 = vmatprep.subr.bf16.mxu0 %v2451_v47 }
 0x176   : > { %1940 = vmatpush1.bf16.msra.mxu0 %v2476_v58 }
 0x177   : > { %946 = vmatprep.subr.mxu0 %v2440_v40 }
 0x17a   : > { %948 = vmatpush1.msra.mxu0 %v2456_v50 }
 0x17b   : > { %1005 = vmatmul.mubr.f32.vlgmr.msra.gmra.mrb[0].mxu0 %v2417_v8 }
 0x24e   : > { %v1006_v23 = vpop.f32.mrb[0].mxu0 }
 0x24f   : > { %v1989_v26 = vadd.f32 %v1006_v23, %v429_v21  ;;  %v1008_v30 = vpop.f32.mrb[1].mxu0 }
 0x250   : > { %v1990_v31 = vadd.f32 %v1008_v30, %v429_v21 }
 0x251   : > { %v1011_v33 = vsel %vm435_vm11, %v1989_v26, 0.0  ;;  %v1016_v37 = vmul.f32 %v1989_v26, %v1989_v26 }
 0x252   : > { %v1012_v38 = vsel %vm435_vm11, %v1990_v31, 0.0  ;;  %v1017_v39 = vmul.f32 %v1990_v31, %v1990_v31 }
 0x253   : > { %v1013_v42 = vadd.f32 %v1012_v38, %v1011_v33  ;;  %v1018_v43 = vsel %vm435_vm11, %v1016_v37, 0.0 }
 0x254   : > { %v1019_v40 = vsel %vm435_vm11, %v1017_v39, 0.0 }
 0x255   : > { %1014 = vadd.xlane.f32.xlu1 %v1013_v42  ;;  %v1020_v44 = vadd.f32 %v1019_v40, %v1018_v43  ;;  %v1168_v40 = vld [vmem:[%s2800_s3] sm:$0xf] }
 0x257   : > { %1021 = vadd.xlane.f32.xlu0 %v1020_v44 }
 0x2e2   : > { %v1015_v8 = vpop.xlane.xlu1 %1014 }
 0x2e3   : > { %v1023_v45 = vmul.f32 0.00390625, %v1015_v8  ;;  %v1186_v8 = vsel %vm431_vm10, %v1168_v40, 0 }
 0x2e4   : > { %v1022_v46 = vpop.xlane.xlu0 %1021 }
 0x2e5   : > { %v1024_v47 = vmul.f32 0.00390625, %v1022_v46  ;;  %v1025_v48 = vmul.f32 %v1023_v45, %v1023_v45  ;;  %v1028_v53 = vsub.f32 %v1989_v26, %v1023_v45  ;;  %v1029_v58 = vsub.f32 %v1990_v31, %v1023_v45 }
 0x2e7   : > { %v1026_v49 = vsub.f32 %v1024_v47, %v1025_v48 }
 0x2e9   : > { %v1027_v50 = vmax.f32 %v1026_v49, 0.0 }
 0x2eb   : > { %v1030_v52 = vadd.f32 1e-05, %v1027_v50 }
 0x2ed   : > { %2067 = vrsqrt.f32 %v1030_v52 }
 0x2f7   : > { %v2068_v60 = vpop.eup %2067 }
 0x2f8   : > { %v1033_v61 = vmul.f32 %v2068_v60, %v1029_v58  ;;  %v1032_v62 = vmul.f32 %v2068_v60, %v1028_v53 }
 0x2fa   : > { %v1035_v63 = vmax.f32 %v1033_v61, 0.0  ;;  %v1034_v1 = vmax.f32 %v1032_v62, 0.0  ;;  %v2611_v61 = vand.u32 4294901760, %v1186_v8 }
 0x2fc   : > { %1040 = vrot.lane.b32.xlu0 %v1035_v63, %s2170_s12  ;;  %1123 = vst [vmem:[#allocation2 + $0x28] sm:$0xf] %v1035_v63  ;;  %1038 = vrot.lane.b32.xlu1 %v1034_v1, %s2170_s12  ;;  %1122 = vst [vmem:[#allocation2 + $0x20] sm:$0xf] %v1034_v1  ;;  %v2614_v3 = vsub.f32 %v1186_v8, %v2611_v61  ;;  %s1807_s12 = sshll.u32 %s240_s15, 4  ;;  %s2755_s12 = int_to_ptr.vmem [resolvable:$true] %s1807_s12 }
 0x2fd   : > { %s2101_s26 = scalar_lea.vmem %s2755_s12, 128  ;;  %p2108_p7 = scmp.lt.s32.totalorder %s2755_s12, %s2106_s17 }
 0x2fe   : > { %p2102_p6 = scmp.ne.s32.totalorder %s2755_s12, %s2101_s26  ;;  %p2109_p10 = scmp.lt.s32.totalorder %s2107_s28, %s2101_s26 }
 0x300   : > { %1094 = vrot.lane.b32.xlu0 %v1034_v1, %s2172_s29  ;;  %1047 = vrot.lane.b32.xlu1 %v1035_v63, %s2171_s14  ;;  %p2103_p12 = pnand %p2102_p6, %p2819_p11  ;;  %p2110_p2 = por %p2109_p10, %p2108_p7 }
 0x302   : > { %p2104_p13 = pneg %p2103_p12 }
 0x304   : > { %1103 = vrot.lane.b32.xlu0 %v1035_v63, %s2173_s16  ;;  %1050 = vrot.lane.b32.xlu1 %v1034_v1, %s2171_s14  ;;  %p2111_p4 = pnand %p2110_p2, %p2104_p13 }
 0x308   : > { %1096 = vrot.lane.b32.xlu1 %v1035_v63, %s2172_s29 }
 0x30c   : > { %1106 = vrot.lane.b32.xlu1 %v1034_v1, %s2173_s16 }
 0x36e   : > { %v1039_v2 = vpop.permute.xlu1 %1038  ;;  %v1041_v5 = vpop.permute.xlu0 %1040 }
 0x36f   : > { %v1042_v9 = vsel %vm283_vm0, %v1039_v2, %v1041_v5  ;;  %v1046_v14 = vsel %vm283_vm0, %v1041_v5, %v1039_v2 }
 0x372   : > { %v1048_v6 = vpop.permute.xlu1 %1047  ;;  %v1095_v17 = vpop.permute.xlu0 %1094 }
 0x376   : > { %v1051_v7 = vpop.permute.xlu1 %1050  ;;  %v1104_v12 = vpop.permute.xlu0 %1103 }
 0x377   : > { %v1052_v15 = vsel %vm294_vm1, %v1051_v7, %v1048_v6  ;;  %v1055_v16 = vsel %vm294_vm1, %v1048_v6, %v1051_v7 }
 0x378   : > { %v1056_v18 = vsel %vm2350_vm3, %v1042_v9, %v1055_v16  ;;  %v1057_v19 = vsel %vm2346_vm2, %v1046_v14, %v1052_v15  ;;  %v1058_v20 = vsel %vm2358_vm5, %v1055_v16, %v1042_v9  ;;  %v1059_v24 = vsel %vm2354_vm4, %v1052_v15, %v1046_v14 }
 0x379   : > { %1062 = vrot.lane.b32.xlu0 %v1056_v18, %s2172_s29  ;;  %v1084_v25 = vrot.slane %v1056_v18, 4  ;;  %1064 = vrot.lane.b32.xlu1 %v1057_v19, %s2172_s29  ;;  %v1085_v27 = vrot.slane %v1057_v19, 4  ;;  %v1158_v28 = vrot.slane %v1058_v20, 4  ;;  %v1159_v29 = vrot.slane %v1059_v24, 4 }
 0x37a   : > { %v1097_v32 = vpop.permute.xlu1 %1096 }
 0x37b   : > { %1088 = vst [vmem:[#allocation2 + $0x10] sm:$0xf0] %v1084_v25  ;;  %1089 = vst [vmem:[#allocation2 + $0x18] sm:$0xf0] %v1085_v27  ;;  %v1098_v10 = vsel %vm309_vm6, %v1095_v17, %v1097_v32  ;;  %v1102_v34 = vsel %vm309_vm6, %v1097_v32, %v1095_v17 }
 0x37c   : > { %1162 = vst [vmem:[#allocation2 + $0x20] sm:$0xf0] %v1158_v28  ;;  %1163 = vst [vmem:[#allocation2 + $0x28] sm:$0xf0] %v1159_v29  ;;  %v1128_v11 = vrot.slane %v1098_v10, 4  ;;  %v1271_v28 = vand.u32 4294901760, %v2614_v3 }
 0x37d   : > { %1071 = vrot.lane.b32.xlu0 %v1057_v19, %s2173_s16  ;;  %1074 = vrot.lane.b32.xlu1 %v1056_v18, %s2173_s16 }
 0x37e   : > { %1132 = vst [vmem:[#allocation2 + $0x30] sm:$0xf0] %v1128_v11  ;;  %v1107_v13 = vpop.permute.xlu1 %1106 }
 0x37f   : > { %v1108_v35 = vsel %vm320_vm7, %v1107_v13, %v1104_v12  ;;  %v1111_v36 = vsel %vm320_vm7, %v1104_v12, %v1107_v13 }
 0x380   : > { %v1112_v51 = vsel %vm273_vm9, %v1098_v10, %v1111_v36  ;;  %v1117_v54 = vrot.slane %v1108_v35, 4  ;;  %v1125_v55 = vsel %vm276_vm8, %v1108_v35, %v1102_v34 }
 0x381   : > { %v1116_v56 = vrot.slane %v1112_v51, 4  ;;  %v1129_v57 = vrot.slane %v1125_v55, 4  ;;  %1136 = vrot.lane.b32.xlu0 %v1058_v20, %s2172_s29  ;;  %1138 = vrot.lane.b32.xlu1 %v1059_v24, %s2172_s29 }
 0x382   : > { %1121 = vst [vmem:[#allocation2 + $0x8] sm:$0xf0] %v1117_v54 }
 0x383   : > { %1120 = vst [vmem:[#allocation2] sm:$0xf0] %v1116_v56  ;;  %1133 = vst [vmem:[#allocation2 + $0x38] sm:$0xf0] %v1129_v57  ;;  %v1174_v63 = vld [vmem:[#allocation2 + $0x28] sm:$0xff]  ;;  %v1173_v7 = vld [vmem:[#allocation2 + $0x20] sm:$0xff] }
 0x384   : > { %v1202_v6 = vand.u32 4294901760, %v1174_v63  ;;  %v1204_v18 = vand.u32 4294901760, %v1173_v7 }
 0x385   : > { %1145 = vrot.lane.b32.xlu0 %v1059_v24, %s2173_s16  ;;  %1148 = vrot.lane.b32.xlu1 %v1058_v20, %s2173_s16  ;;  %s2753_s16 = scalar_lea.hbm %s2802_s5, %s1892_s23 }
 0x386   : > { %v2622_v24 = vsub.f32 %v1174_v63, %v1202_v6  ;;  %v2641_v54 = vsub.f32 %v1173_v7, %v1204_v18 }
 0x389   : > { %1182 = vperm.xlu0 %2065, %v1179_v59   ;;  %v1306_v59 = vand.u32 4294901760, %v2622_v24 }
 0x3eb   : > { %v1063_v22 = vpop.permute.xlu0 %1062  ;;  %v1065_v21 = vpop.permute.xlu1 %1064 }
 0x3ec   : > { %v1066_v23 = vsel %vm309_vm6, %v1063_v22, %v1065_v21  ;;  %v1070_v31 = vsel %vm309_vm6, %v1065_v21, %v1063_v22  ;;  %v1272_v21 = vsub.f32 %v2614_v3, %v1271_v28 }
 0x3ed   : > { %1092 = vst [vmem:[#allocation2 + $0x30] sm:$0xf] %v1066_v23 }
 0x3ef   : > { %v1072_v26 = vpop.permute.xlu0 %1071  ;;  %v1075_v30 = vpop.permute.xlu1 %1074 }
 0x3f0   : > { %v1076_v33 = vsel %vm320_vm7, %v1075_v30, %v1072_v26  ;;  %v1079_v37 = vsel %vm320_vm7, %v1072_v26, %v1075_v30 }
 0x3f1   : > { %v1080_v38 = vsel %vm273_vm9, %v1066_v23, %v1079_v37  ;;  %1083 = vst [vmem:[#allocation2 + $0x8] sm:$0xf] %v1076_v33  ;;  %v1091_v39 = vsel %vm276_vm8, %v1076_v33, %v1070_v31 }
 0x3f2   : > { %1082 = vst [vmem:[#allocation2] sm:$0xf] %v1080_v38  ;;  %1093 = vst [vmem:[#allocation2 + $0x38] sm:$0xf] %v1091_v39 }
 0x3f3   : > { %v1137_v42 = vpop.permute.xlu0 %1136  ;;  %v1139_v43 = vpop.permute.xlu1 %1138 }
 0x3f4   : > { %v1140_v44 = vsel %vm309_vm6, %v1137_v42, %v1139_v43  ;;  %v1144_v47 = vsel %vm309_vm6, %v1139_v43, %v1137_v42  ;;  %v1175_v1 = vld [vmem:[#allocation2 + $0x30] sm:$0xff]  ;;  %v1312_v43 = vand.u32 4294901760, %v2641_v54 }
 0x3f5   : > { %1166 = vst [vmem:[#allocation2 + $0x40] sm:$0xf] %v1140_v44  ;;  %v1208_v9 = vand.u32 4294901760, %v1175_v1 }
 0x3f7   : > { %v1146_v45 = vpop.permute.xlu0 %1145  ;;  %v1149_v46 = vpop.permute.xlu1 %1148  ;;  %v2624_v25 = vsub.f32 %v1175_v1, %v1208_v9  ;;  %v2670_v38 = vpack.c.bf16 %v1208_v9, %v1204_v18 }
 0x3f8   : > { %v1150_v48 = vsel %vm320_vm7, %v1149_v46, %v1146_v45  ;;  %v1153_v49 = vsel %vm320_vm7, %v1146_v45, %v1149_v46  ;;  %v1170_v50 = vld [vmem:[#allocation2 + $0x8] sm:$0xff] }
 0x3f9   : > { %v1154_v52 = vsel %vm273_vm9, %v1140_v44, %v1153_v49  ;;  %1157 = vst [vmem:[#allocation2 + $0x18] sm:$0xf] %v1150_v48  ;;  %v1165_v53 = vsel %vm276_vm8, %v1150_v48, %v1144_v47  ;;  %v1169_v58 = vld [vmem:[#allocation2] sm:$0xff]  ;;  %v1176_v60 = vld [vmem:[#allocation2 + $0x38] sm:$0xff]  ;;  %v1194_v62 = vand.u32 4294901760, %v1170_v50  ;;  %v1324_v26 = vand.u32 4294901760, %v2624_v25 }
 0x3fa   : > { %1156 = vst [vmem:[#allocation2 + $0x10] sm:$0xf] %v1154_v52  ;;  %1167 = vst [vmem:[#allocation2 + $0x48] sm:$0xf] %v1165_v53  ;;  %v1206_v2 = vand.u32 4294901760, %v1176_v60  ;;  %v1196_v5 = vand.u32 4294901760, %v1169_v58  ;;  %v1307_v44 = vsub.f32 %v2622_v24, %v1306_v59  ;;  %v1313_v53 = vsub.f32 %v2641_v54, %v1312_v43 }
 0x3fb   : > { %v2616_v14 = vsub.f32 %v1170_v50, %v1194_v62  ;;  %v1325_v46 = vsub.f32 %v2624_v25, %v1324_v26  ;;  %v1273_v48 = vand.u32 4294901760, %v1272_v21 }
 0x3fc   : > { %v2618_v4 = vsub.f32 %v1176_v60, %v1206_v2  ;;  %v1177_v15 = vld [vmem:[#allocation2 + $0x40] sm:$0xf]  ;;  %v2620_v17 = vsub.f32 %v1169_v58, %v1196_v5  ;;  %v2645_v56 = vpack.c.bf16 %v1206_v2, %v1202_v6  ;;  %v1308_v60 = vand.u32 4294901760, %v1307_v44 }
 0x3fd   : > { %v1189_v10 = vsel %vm435_vm11, %v1177_v15, 0  ;;  %v1282_v11 = vand.u32 4294901760, %v2616_v14  ;;  %v1326_v63 = vand.u32 4294901760, %v1325_v46  ;;  %v1314_v6 = vand.u32 4294901760, %v1313_v53 }
 0x3fe   : > { %v1318_v35 = vand.u32 4294901760, %v2618_v4  ;;  %v1288_v55 = vand.u32 4294901760, %v2620_v17  ;;  %v2650_v22 = vand.u32 4294901760, %v1189_v10 }
 0x3ff   : > { %v1283_v30 = vsub.f32 %v2616_v14, %v1282_v11  ;;  %v1955_v7 = vpack.c.bf16 %v1326_v63, %v1314_v6 }
 0x400   : > { %v1172_v16 = vld [vmem:[#allocation2 + $0x18] sm:$0xff]  ;;  %v1319_v33 = vsub.f32 %v2618_v4, %v1318_v35  ;;  %v1289_v39 = vsub.f32 %v2620_v17, %v1288_v55  ;;  %v1335_v8 = vsub.f32 %v1189_v10, %v2650_v22  ;;  %v1977_v10 = vpack.c.bf16 %v1318_v35, %v1306_v59 }
 0x401   : > { %v1198_v19 = vand.u32 4294901760, %v1172_v16  ;;  %v1171_v20 = vld [vmem:[#allocation2 + $0x10] sm:$0xff]  ;;  %v1178_v27 = vld [vmem:[#allocation2 + $0x48] sm:$0xf]  ;;  %v1284_v47 = vand.u32 4294901760, %v1283_v30 }
 0x402   : > { %v1200_v29 = vand.u32 4294901760, %v1171_v20  ;;  %v1192_v32 = vsel %vm435_vm11, %v1178_v27, 0  ;;  %v1320_v49 = vand.u32 4294901760, %v1319_v33  ;;  %v1290_v52 = vand.u32 4294901760, %v1289_v39 }
 0x403   : > { %v2630_v12 = vpack.c.bf16 %v1198_v19, %v1194_v62  ;;  %v2632_v13 = vsub.f32 %v1172_v16, %v1198_v19  ;;  %v2634_v34 = vand.u32 4294901760, %v1192_v32  ;;  %v1336_v1 = vand.u32 4294901760, %v1335_v8 }
 0x404   : > { %v2637_v36 = vpack.c.bf16 %v1200_v29, %v1196_v5  ;;  %v2639_v51 = vsub.f32 %v1171_v20, %v1200_v29  ;;  %v1953_v2 = vpack.c.bf16 %v1320_v49, %v1308_v60  ;;  %v1961_v20 = vpack.c.bf16 %v2618_v4, %v2622_v24 }
 0x405   : > { %1942 = vmatprep.subr.bf16.mxu1 %v2630_v12  ;;  %v1294_v57 = vand.u32 4294901760, %v2632_v13  ;;  %v2668_v37 = vsub.f32 %v1192_v32, %v2634_v34  ;;  %v1337_v9 = vsub.f32 %v1335_v8, %v1336_v1  ;;  %v1957_v18 = vpack.c.bf16 %v2632_v13, %v2616_v14 }
 0x406   : > { %1944 = vmatpush1.bf16.msra.mxu1 %v2637_v36  ;;  %v1300_v23 = vand.u32 4294901760, %v2639_v51  ;;  %v1959_v19 = vpack.c.bf16 %v2639_v51, %v2620_v17  ;;  %v1963_v27 = vpack.c.bf16 %v2624_v25, %v2641_v54  ;;  %v1979_v14 = vpack.c.bf16 %v1324_v26, %v1312_v43 }
 0x407   : > { %1946 = vmatprep.subr.bf16.mxu1 %v2645_v56  ;;  %v1295_v31 = vsub.f32 %v2632_v13, %v1294_v57  ;;  %v1330_v50 = vand.u32 4294901760, %v2668_v37  ;;  %v1338_v16 = vand.u32 4294901760, %v1337_v9  ;;  %v1973_v29 = vpack.c.bf16 %v1294_v57, %v1282_v11 }
 0x408   : > { %v1301_v42 = vsub.f32 %v2639_v51, %v1300_v23  ;;  %v1975_v32 = vpack.c.bf16 %v1300_v23, %v1288_v55 }
 0x409   : > { %v1296_v40 = vand.u32 4294901760, %v1295_v31  ;;  %v1331_v5 = vsub.f32 %v2668_v37, %v1330_v50 }
 0x40a   : > { %1948 = vmatpush1.bf16.msra.mxu1 %v2670_v38  ;;  %v1302_v45 = vand.u32 4294901760, %v1301_v42 }
 0x40b   : > { %1211 = vmatprep.subr.mxu1 %v2634_v34  ;;  %v1949_v58 = vpack.c.bf16 %v1296_v40, %v1284_v47  ;;  %v1332_v15 = vand.u32 4294901760, %v1331_v5 }
 0x40c   : > { %v1951_v62 = vpack.c.bf16 %v1302_v45, %v1290_v52 }
 0x40e   : > { %1213 = vmatpush1.msra.mxu1 %v2650_v22 }
 0x40f   : > { %1950 = vmatprep.subr.bf16.mxu1 %v1949_v58  ;;  %1274 = vmatmul.mubr.f32.vlgmr.msra.gmra.mrb[0].mxu1 %v1273_v48 }
 0x410   : > { %1952 = vmatpush1.bf16.msra.mxu1 %v1951_v62  ;;  %1394 = vmatprep.mubr.f32.mxu1 %v2174_v41 }
 0x411   : > { %1954 = vmatprep.subr.bf16.mxu1 %v1953_v2 }
 0x414   : > { %1956 = vmatpush1.bf16.msra.mxu1 %v1955_v7 }
 0x415   : > { %1333 = vmatprep.subr.mxu1 %v1332_v15 }
 0x418   : > { %1339 = vmatpush1.msra.mxu1 %v1338_v16 }
 0x419   : > { %1958 = vmatprep.subr.bf16.mxu1 %v1957_v18  ;;  %1396 = vmatmul.mubr.f32.vlgmr.msra.gmra.mrb[0].mxu1 %v2611_v61 }
 0x41a   : > { %1960 = vmatpush1.bf16.msra.mxu1 %v1959_v19  ;;  %1486 = vmatprep.mubr.f32.mxu1 %v2174_v41 }
 0x41b   : > { %1962 = vmatprep.subr.bf16.mxu1 %v1961_v20 }
 0x41e   : > { %1964 = vmatpush1.bf16.msra.mxu1 %v1963_v27 }
 0x41f   : > { %1428 = vmatprep.subr.mxu1 %v2668_v37 }
 0x422   : > { %1431 = vmatpush1.msra.mxu1 %v1335_v8 }
 0x423   : > { %1966 = vmatprep.subr.bf16.mxu1 %v2630_v12  ;;  %1489 = vmatmul.mubr.f32.vlgmr.msra.gmra.mrb[0].mxu1 %v2614_v3  ;;  %v1183_v3 = vpop.permute.xlu0 %1182 }
 0x424   : > { %1968 = vmatpush1.bf16.msra.mxu1 %v2637_v36  ;;  %1569 = vmatprep.mubr.f32.mxu1 %v2174_v41 }
 0x425   : > { %1970 = vmatprep.subr.bf16.mxu1 %v2645_v56 }
 0x428   : > { %1972 = vmatpush1.bf16.msra.mxu1 %v2670_v38 }
 0x429   : > { %1512 = vmatprep.subr.mxu1 %v2634_v34 }
 0x42c   : > { %1514 = vmatpush1.msra.mxu1 %v2650_v22 }
 0x42d   : > { %1974 = vmatprep.subr.bf16.mxu1 %v1973_v29  ;;  %1573 = vmatmul.mubr.f32.vlgmr.msra.gmra.mrb[0].mxu1 %v1271_v28 }
 0x42e   : > { %1976 = vmatpush1.bf16.msra.mxu1 %v1975_v32  ;;  %1673 = vmatprep.mubr.f32.mxu1 %v2174_v41 }
 0x42f   : > { %1978 = vmatprep.subr.bf16.mxu1 %v1977_v10 }
 0x432   : > { %1980 = vmatpush1.bf16.msra.mxu1 %v1979_v14 }
 0x433   : > { %1614 = vmatprep.subr.mxu1 %v1330_v50 }
 0x436   : > { %1618 = vmatpush1.msra.mxu1 %v1336_v1 }
 0x437   : > { %1982 = vmatprep.subr.bf16.mxu1 %v2630_v12  ;;  %1675 = vmatmul.mubr.f32.vlgmr.msra.gmra.mrb[0].mxu1 %v2611_v61 }
 0x438   : > { %1984 = vmatpush1.bf16.msra.mxu1 %v2637_v36  ;;  %1755 = vmatprep.mubr.f32.mxu1 %v2174_v41 }
 0x439   : > { %1986 = vmatprep.subr.bf16.mxu1 %v2645_v56 }
 0x43c   : > { %1988 = vmatpush1.bf16.msra.mxu1 %v2670_v38 }
 0x43d   : > { %1698 = vmatprep.subr.mxu1 %v2634_v34 }
 0x440   : > { %1700 = vmatpush1.msra.mxu1 %v2650_v22 }
 0x441   : > { %1757 = vmatmul.mubr.f32.vlgmr.msra.gmra.mrb[0].mxu1 %v2611_v61 }
 0x514   : > { %v1758_v4 = vpop.f32.mrb[0].mxu1 }
 0x515   : > { %v1991_v17 = vadd.f32 %v1758_v4, %v1183_v3  ;;  %v1760_v24 = vpop.f32.mrb[1].mxu1 }
 0x516   : > { %v1992_v25 = vadd.f32 %v1760_v24, %v1183_v3 }
 0x517   : > { %v1763_v28 = vsel %vm435_vm11, %v1991_v17, 0.0  ;;  %v1768_v11 = vmul.f32 %v1991_v17, %v1991_v17 }
 0x518   : > { %v1764_v41 = vsel %vm435_vm11, %v1992_v25, 0.0  ;;  %v1769_v12 = vmul.f32 %v1992_v25, %v1992_v25 }
 0x519   : > { %v1765_v13 = vadd.f32 %v1764_v41, %v1763_v28  ;;  %v1770_v35 = vsel %vm435_vm11, %v1768_v11, 0.0 }
 0x51a   : > { %v1771_v34 = vsel %vm435_vm11, %v1769_v12, 0.0 }
 0x51b   : > { %1766 = vadd.xlane.f32.xlu1 %v1765_v13  ;;  %v1772_v36 = vadd.f32 %v1771_v34, %v1770_v35 }
 0x51d   : > { %1773 = vadd.xlane.f32.xlu0 %v1772_v36 }
 0x5a8   : > { %v1767_v61 = vpop.xlane.xlu1 %1766 }
 0x5a9   : > { %v1775_v51 = vmul.f32 0.00390625, %v1767_v61 }
 0x5aa   : > { %v1774_v54 = vpop.xlane.xlu0 %1773 }
 0x5ab   : > { %v1776_v55 = vmul.f32 0.00390625, %v1774_v54  ;;  %v1777_v56 = vmul.f32 %v1775_v51, %v1775_v51  ;;  %v1780_v21 = vsub.f32 %v1991_v17, %v1775_v51  ;;  %v1781_v23 = vsub.f32 %v1992_v25, %v1775_v51 }
 0x5ad   : > { %v1778_v57 = vsub.f32 %v1776_v55, %v1777_v56 }
 0x5af   : > { %v1779_v59 = vmax.f32 %v1778_v57, 0.0 }
 0x5b1   : > { %v1782_v22 = vadd.f32 1e-05, %v1779_v59 }
 0x5b3   : > { %2069 = vrsqrt.f32 %v1782_v22 }
 0x5bd   : > { %v2070_v26 = vpop.eup %2069 }
 0x5be   : > { %v1784_v30 = vmul.f32 %v2070_v26, %v1780_v21  ;;  %v1785_v31 = vmul.f32 %v2070_v26, %v1781_v23 }
 0x5c0   : > { %v1788_v33 = vcombine.low %v1784_v30, %v1785_v31 }
 0x5c2   : > { %v1790_v37 = vadd.f32 %v1788_v33, %v2322_v0 }
 0x5c4   : > { %1791 = vst [vmem:[%s240_s15] sm:$0xff] %v1790_v37 }
 0x5c5   : > { %2114 = shalt.err (!%p2111_p4)
}
 0x5c6   : > { %s2115_s13 = scalar_lea.hbm %s2753_s16, 128  ;;  %s2119_s9 = scalar_lea.hbm %s2802_s5, 256 }
 0x5c7   : > { %p2116_p5 = scmp.ne.s32.totalorder %s2753_s16, %s2115_s13  ;;  %p2120_p0 = scmp.lt.u32.totalorder %s2753_s16, %s2802_s5 }
 0x5c8   : > { %p2121_p1 = scmp.lt.u32.totalorder %s2119_s9, %s2115_s13  ;;  %p2123_p6 = scmp.lt.u32.totalorder %s2115_s13, %s2753_s16 }
 0x5c9   : > { %p2117_p8 = pnand %p2116_p5, %p2819_p11 }
 0x5ca   : > { %p2122_p3 = por %p2121_p1, %p2120_p0 }
 0x5cb   : > { %p2118_p9 = pneg %p2117_p8 }
 0x5cc   : > { %p2124_p12 = por %p2123_p6, %p2122_p3 }
 0x5ce   : > { %p2125_p13 = pnand %p2124_p12, %p2118_p9 }
 0x5d0   : > { %2128 = shalt.err (!%p2125_p13)
}
 0x5d1   : > { %2015 = dma.vmem_to_hbm [thread:$0]  (%p2819_p11), %s2755_s12, 128, %s2753_s16, %s1793_s25  }
 0x5d2 PF: > { %s1819_s23 = sand.u32 1, %s2155_s18   ;;  %p2820_p7 = scmp.ne.s32.totalorder %s2807_s6, 0 }
 0x5d3   : > { %p2821_p10 = scmp.ge.s32.totalorder %s2167_s21, 2  ;;  %s1820_s15 = scalar_lea.sflag [#allocation5], %s1819_s23 }
 0x5d5   : > { %p2022_p2 = pnand %p2821_p10, %p2820_p7 }
 0x5d7   : > { %2150 = dma.done.wait (!%p2022_p2), %s1820_s15, 128  }
 0x5d8   : > { %2152 = vsyncadd (!%p2022_p2), %s1820_s15, 4294967168  ;;  %p18_p4 = scmp.ge.s32.totalorder %s2232_s24, 4   ;;  %s2822_s18 = smov %s2159_s19 }
 0x5d9   : > { %s2823_s19 = smov %s2163_s20  ;;  %s2824_s20 = smov %s2244_s27 }
 0x5da   : > { %s2825_s21 = smov %s2232_s24  ;;  %20 = sbr.rel (!%p18_p4) target bundleno = 5 (0x5), region = 85 }
 0x5e1   :  { %1825 = vsyncpa [#allocation4], 1 }
 0x5e2   :  { %1827 = vsyncpa [#allocation4 + $0x1], 1 }
 0x5e3   :  { %1828 = vsyncpa [#allocation5], 1 }
 0x5e4   :  { %1830 = vsyncpa [#allocation5 + $0x1], 1 }

</bundles_post_ra>
